<compile_context>
chip_gen: v6e
topology: v6e:2x2x1
jax: 0.10.0
libtpu: 0.0.40
codegen_flags: <defaults>
</compile_context>

<pallas_src>
import numpy as np
import jax
import jax.numpy as jnp
from jax.experimental import pallas as pl
from jax.experimental.pallas import tpu as pltpu


# ----------------------------------------------------------------------------
# Tiling helpers
# ----------------------------------------------------------------------------
def _round_up(x, m):
    return ((x + m - 1) // m) * m


def _pick_seq_tile(l_pad, n_batch, max_tl):
    """Largest multiple-of-128 divisor of l_pad that is <= cap.

    l_pad must already be a multiple of 128.  When N == 1 the cap is reduced
    to l_pad // 2 so the grid has >= 2 parallel steps (keeps both v7x
    TensorCores busy); v5e/v6e (1 TC) are unaffected.
    """
    cap = max(128, (int(max_tl) // 128) * 128)        # robust to odd max_tl
    if n_batch == 1 and l_pad >= 256:
        cap = min(cap, max(128, (l_pad // 2 // 128) * 128))
    tl = min(l_pad, cap)
    while l_pad % tl != 0:                            # terminates at tl == 128
        tl -= 128
    return tl


# ----------------------------------------------------------------------------
# Fused pointwise-conv heads, streaming over (N, L)
# ----------------------------------------------------------------------------
def _make_heads_kernel(head_sizes):
    offsets = [0]
    for k in head_sizes:
        offsets.append(offsets[-1] + int(k))

    def kernel(x_ref, w_ref, b_ref, *o_refs):
        # x_ref: (1, C, tl) f32   w_ref: (K, C) bf16   b_ref: (K, 1) f32
        # o_refs[i]: (1, K_i, tl)
        xb = x_ref[0].astype(w_ref.dtype)           # in-kernel bf16 cast (VPU)
        acc = jnp.dot(w_ref[...], xb, preferred_element_type=jnp.float32)
        acc = acc + b_ref[...]                      # (K, 1) broadcast
        for i, o_ref in enumerate(o_refs):          # static row slices -> cheap
            o_ref[0] = acc[offsets[i]:offsets[i + 1], :].astype(o_ref.dtype)

    return kernel


def pointwise_conv1d_heads(x_ncl, w_fused_bf16, b_fused_k1, head_sizes, *,
                           max_tl=8192, out_dtype=jnp.float32):
    """Fused 1x1 Conv1d heads: out_i[n,k,l] = sum_c W_i[k,c]*x[n,c,l] + b_i[k].

    x_ncl:        (N, C, L)  float32 (cast to bf16 inside the kernel)
    w_fused_bf16: (K, C)     bfloat16, heads concatenated along K
    b_fused_k1:   (K, 1)     float32
    returns       list of (N, K_i, L) arrays of out_dtype (one per head)
    """
    N, C, L = x_ncl.shape
    K = int(w_fused_bf16.shape[0])
    head_sizes = [int(k) for k in head_sizes]
    assert sum(head_sizes) == K

    # Pad L up to a multiple of 128 (bounded blocks, unmasked lane-dense
    # stores); the pad is sliced off after the kernel.
    L_pad = _round_up(L, 128)
    if L_pad != L:
        x_ncl = jnp.pad(x_ncl, ((0, 0), (0, 0), (0, L_pad - L)))
    tl = _pick_seq_tile(L_pad, N, max_tl)

    x_isz = x_ncl.dtype.itemsize
    o_isz = jnp.dtype(out_dtype).itemsize
    cost = pl.CostEstimate(
        flops=2 * N * L_pad * C * K,
        transcendentals=0,
        bytes_accessed=(N * C * L_pad * x_isz           # X read once (f32)
                        + K * C * 2 + K * 4             # resident params
                        + N * K * L_pad * o_isz))       # output writes

    # Double-buffered x tile + per-head output tiles + resident params.
    vmem_bytes = (2 * C * tl * x_isz + 2 * K * tl * o_isz + K * C * 2 + K * 4)
    vmem_limit = int(min(max(vmem_bytes + (8 << 20), 32 << 20), 48 << 20))

    out_shape = tuple(jax.ShapeDtypeStruct((N, k, L_pad), out_dtype)
                      for k in head_sizes)
    out_specs = tuple(pl.BlockSpec((1, k, tl), lambda n, l: (n, 0, l))
                      for k in head_sizes)

    outs = pl.pallas_call(
        _make_heads_kernel(head_sizes),
        out_shape=out_shape,
        grid_spec=pltpu.PrefetchScalarGridSpec(
            num_scalar_prefetch=0,
            grid=(N, L_pad // tl),
            in_specs=[
                # NOTE: if profiling shows exposed x DMA at moderate tl, add
                # pipeline_mode=pl.Buffered(3) here (plenty of VMEM headroom).
                pl.BlockSpec((1, C, tl), lambda n, l: (n, 0, l)),
                pl.BlockSpec((K, C), lambda n, l: (0, 0)),
                pl.BlockSpec((K, 1), lambda n, l: (0, 0)),
            ],
            out_specs=out_specs,
        ),
        compiler_params=pltpu.CompilerParams(
            dimension_semantics=("parallel", "parallel"),
            vmem_limit_bytes=vmem_limit),
        cost_estimate=cost,
    )(x_ncl, w_fused_bf16, b_fused_k1)

    if L_pad != L:
        outs = tuple(o[:, :, :L] for o in outs)
    return list(outs)


# ----------------------------------------------------------------------------
# Tiny single-block GEMM for the many_to_one_takelast path (lane dim = K,
# not 1; avoids a (N, C, 1) masked-single-lane streaming call).
# ----------------------------------------------------------------------------
def _make_last_kernel(head_sizes):
    offsets = [0]
    for k in head_sizes:
        offsets.append(offsets[-1] + int(k))

    def kernel(x_ref, w_ref, b_ref, *o_refs):
        # x_ref: (N, C) f32   w_ref: (K, C) bf16   b_ref: (K, 1) f32
        xb = x_ref[...].astype(w_ref.dtype)
        acc = jax.lax.dot_general(                      # (N, K): contract C
            xb, w_ref[...], (((1,), (1,)), ((), ())),
            preferred_element_type=jnp.float32)
        acc = acc + b_ref[...].T                        # (1, K) broadcast
        for i, o_ref in enumerate(o_refs):
            o_ref[...] = acc[:, offsets[i]:offsets[i + 1]].astype(o_ref.dtype)

    return kernel


def pointwise_heads_last(x_nc, w_fused_bf16, b_fused_k1, head_sizes, *,
                         out_dtype=jnp.float32):
    """Project only the last timestep: list of (N, K_i, 1) arrays."""
    N, _ = x_nc.shape
    head_sizes = [int(k) for k in head_sizes]
    out_shape = tuple(jax.ShapeDtypeStruct((N, k), out_dtype)
                      for k in head_sizes)
    outs = pl.pallas_call(
        _make_last_kernel(head_sizes),
        out_shape=out_shape,
    )(x_nc, w_fused_bf16, b_fused_k1)
    return [o[:, :, None] for o in outs]


# ----------------------------------------------------------------------------
# BaseNet counterpart
# ----------------------------------------------------------------------------
class BaseNetPallas:
    """JAX/Pallas counterpart of BaseNet with a minimal concrete head."""

    def __init__(self, input_channels=113, num_output_classes=(18,),
                 output_type="many_to_many", keep_intermediates=False,
                 out_dtype=jnp.float32, max_tl=8192, key=None):
        self.output_type = output_type
        self.num_output_classes = list(num_output_classes)
        self.input_channels = input_channels
        self.keep_intermediates = keep_intermediates
        self.padding_lost_per_side = 0
        self.output_stride = 1
        self.out_dtype = out_dtype      # bf16 halves output writes (v5e win)
        self.max_tl = max_tl
        self.build(key=key if key is not None else jax.random.PRNGKey(0))

    def build(self, key):
        # One pointwise Conv1d head per output: weight (K_i, C_in), bias (K_i,).
        self.weights, self.biases = [], []
        scale = 1.0 / float(np.sqrt(self.input_channels))
        for k in self.num_output_classes:
            key, wk, bk = jax.random.split(key, 3)
            self.weights.append(
                jax.random.uniform(wk, (k, self.input_channels),
                                   jnp.float32, -scale, scale))
            self.biases.append(
                jax.random.uniform(bk, (k,), jnp.float32, -scale, scale))
        # Fused, pre-shaped parameters (done ONCE): bf16 weights (K, C) and
        # f32 bias (K, 1) — no per-call astype/reshape.
        kt = int(sum(self.num_output_classes))
        self.w_fused = jnp.concatenate(self.weights, 0).astype(jnp.bfloat16)
        self.b_fused = jnp.concatenate(self.biases, 0).reshape(kt, 1)

    def _forward(self, X):
        # X: (N, C_in, L) -> list of (N, K_i, L); one fused kernel, per-head
        # outputs emitted directly from the pallas_call (no post-slicing).
        return pointwise_conv1d_heads(
            X, self.w_fused, self.b_fused, self.num_output_classes,
            max_tl=self.max_tl, out_dtype=self.out_dtype)

    def forward(self, X):
        if self.output_type == "many_to_one_takelast":
            # Heads are pointwise (1x1 conv, stride 1, no temporal context),
            # so projecting only X[:, :, -1] is exactly equivalent to
            # [y[:, :, [-1]] for y in self._forward(X)] — but is a tiny dense
            # (N, C) @ (C, K) GEMM instead of an L-wide streaming pass.
            x_last = X[:, :, -1]                                  # (N, C)
            return pointwise_heads_last(
                x_last, self.w_fused, self.b_fused, self.num_output_classes,
                out_dtype=self.out_dtype)
        elif self.output_type == "many_to_many":
            return self._forward(X)
        else:
            raise NotImplementedError(self.output_type)
    # TODO(synk): transform_targets is host-side label preprocessing (numpy +
    # scatter one-hot), not part of the device forward pass; not kernelized.


# ----------------------------------------------------------------------------
# Demo / self-test
# ----------------------------------------------------------------------------
if __name__ == "__main__":
    key = jax.random.PRNGKey(0)
    k_x, k_x2, k_p = jax.random.split(key, 3)

    N, C_in, L = 2, 32, 256          # L multiple of 128 -> lane-dense stores
    num_classes = [16, 8]            # two heads, fused into one kernel

    x = jax.random.normal(k_x, (N, C_in, L), jnp.float32)

    net = BaseNetPallas(input_channels=C_in, num_output_classes=num_classes,
                        output_type="many_to_many", key=k_p)
    ys = [jax.block_until_ready(y) for y in net.forward(x)]
    assert ys[0].shape == (N, num_classes[0], L)
    assert ys[1].shape == (N, num_classes[1], L)

    # Full-precision f32 reference; kernel computes in bf16 on the MXU so use
    # a tolerance consistent with bf16 rounding of a C=32-term contraction.
    w_f32 = jnp.concatenate(net.weights, 0)
    b_f32 = jnp.concatenate(net.biases, 0)
    ref = jnp.einsum("kc,ncl->nkl", w_f32, x) + b_f32[None, :, None]
    ref_heads = [ref[:, :num_classes[0], :], ref[:, num_classes[0]:, :]]
    for y, r in zip(ys, ref_heads):
        assert jnp.allclose(y, r, atol=2e-2, rtol=2e-2), \
            float(jnp.max(jnp.abs(y - r)))

    # L not a multiple of 128 -> padded tiling path.
    L2 = 200
    x2 = jax.random.normal(k_x2, (N, C_in, L2), jnp.float32)
    ys2 = [jax.block_until_ready(y) for y in net.forward(x2)]
    assert ys2[0].shape == (N, num_classes[0], L2)
    assert ys2[1].shape == (N, num_classes[1], L2)
    ref2 = jnp.einsum("kc,ncl->nkl", w_f32, x2) + b_f32[None, :, None]
    ref2_heads = [ref2[:, :num_classes[0], :], ref2[:, num_classes[0]:, :]]
    for y, r in zip(ys2, ref2_heads):
        assert jnp.allclose(y, r, atol=2e-2, rtol=2e-2)

    # many_to_one_takelast branch of BaseNet.forward.
    net_m2o = BaseNetPallas(input_channels=C_in, num_output_classes=num_classes,
                            output_type="many_to_one_takelast", key=k_p)
    ys_last = [jax.block_until_ready(y) for y in net_m2o.forward(x)]
    assert ys_last[0].shape == (N, num_classes[0], 1)
    assert ys_last[1].shape == (N, num_classes[1], 1)
    for y, r in zip(ys_last, ref_heads):
        assert jnp.allclose(y[:, :, 0], r[:, :, -1], atol=2e-2, rtol=2e-2)

    print("KERNEL_OK")
</pallas_src>

<mosaic_0001>
module attributes {stable_mosaic.version = 11 : i64} {
  func.func @kernel(%arg0: i32, %arg1: i32, %arg2: memref<1x32x256xf32, #tpu.memory_space<vmem>>, %arg3: memref<24x32xbf16, #tpu.memory_space<vmem>>, %arg4: memref<24x1xf32, #tpu.memory_space<vmem>>, %arg5: memref<1x16x256xf32, #tpu.memory_space<vmem>>, %arg6: memref<1x8x256xf32, #tpu.memory_space<vmem>>) attributes {dimension_semantics = [#tpu.dimension_semantics<parallel>, #tpu.dimension_semantics<parallel>], iteration_bounds = array<i64: 2, 1>, scalar_prefetch = 0 : i64, scratch_operands = 0 : i64, tpu.core_type = #tpu.core_type<tc>, window_params = [{transform_indices = @transform_0, window_bounds = array<i64: 1, 32, 256>}, {pipeline_mode = #tpu.pipeline_mode<synchronous>, transform_indices = @transform_1, window_bounds = array<i64: 24, 32>}, {pipeline_mode = #tpu.pipeline_mode<synchronous>, transform_indices = @transform_2, window_bounds = array<i64: 24, 1>}, {transform_indices = @transform_3, window_bounds = array<i64: 1, 16, 256>}, {transform_indices = @transform_4, window_bounds = array<i64: 1, 8, 256>}]} {
    %c0 = arith.constant 0 : index
    %c0_0 = arith.constant 0 : index
    %c0_1 = arith.constant 0 : index
    %0 = vector.load %arg2[%c0, %c0_0, %c0_1] : memref<1x32x256xf32, #tpu.memory_space<vmem>>, vector<1x32x256xf32>
    %1 = vector.shape_cast %0 : vector<1x32x256xf32> to vector<32x256xf32>
    %2 = arith.truncf %1 : vector<32x256xf32> to vector<32x256xbf16>
    %c0_2 = arith.constant 0 : index
    %c0_3 = arith.constant 0 : index
    %3 = vector.load %arg3[%c0_2, %c0_3] : memref<24x32xbf16, #tpu.memory_space<vmem>>, vector<24x32xbf16>
    %cst = arith.constant dense<0.000000e+00> : vector<24x256xf32>
    %4 = tpu.matmul %3, %2, %cst {dimension_numbers = #tpu.dot_dimension_numbers<[1], [0], [0], [1], [0, 0, 1, 1], [], []>} : vector<24x32xbf16>, vector<32x256xbf16>, vector<24x256xf32> -> vector<24x256xf32>
    %c0_4 = arith.constant 0 : index
    %c0_5 = arith.constant 0 : index
    %5 = vector.load %arg4[%c0_4, %c0_5] : memref<24x1xf32, #tpu.memory_space<vmem>>, vector<24x1xf32>
    %6 = vector.broadcast %5 : vector<24x1xf32> to vector<24x256xf32>
    %7 = arith.addf %4, %6 : vector<24x256xf32>
    %8 = vector.extract_strided_slice %7 {offsets = [0, 0], sizes = [16, 256], strides = [1, 1]} : vector<24x256xf32> to vector<16x256xf32>
    %c0_6 = arith.constant 0 : index
    %c0_7 = arith.constant 0 : index
    %c0_8 = arith.constant 0 : index
    %9 = vector.load %arg5[%c0_6, %c0_7, %c0_8] : memref<1x16x256xf32, #tpu.memory_space<vmem>>, vector<1x16x256xf32>
    %10 = vector.shape_cast %9 : vector<1x16x256xf32> to vector<16x256xf32>
    %11 = vector.shape_cast %8 : vector<16x256xf32> to vector<1x16x256xf32>
    tpu.vector_store %arg5[%c0_6, %c0_7, %c0_8], %11 {strides = array<i32>} : memref<1x16x256xf32, #tpu.memory_space<vmem>>, vector<1x16x256xf32>,
    %12 = vector.extract_strided_slice %7 {offsets = [16, 0], sizes = [8, 256], strides = [1, 1]} : vector<24x256xf32> to vector<8x256xf32>
    %c0_9 = arith.constant 0 : index
    %c0_10 = arith.constant 0 : index
    %c0_11 = arith.constant 0 : index
    %13 = vector.load %arg6[%c0_9, %c0_10, %c0_11] : memref<1x8x256xf32, #tpu.memory_space<vmem>>, vector<1x8x256xf32>
    %14 = vector.shape_cast %13 : vector<1x8x256xf32> to vector<8x256xf32>
    %15 = vector.shape_cast %12 : vector<8x256xf32> to vector<1x8x256xf32>
    tpu.vector_store %arg6[%c0_9, %c0_10, %c0_11], %15 {strides = array<i32>} : memref<1x8x256xf32, #tpu.memory_space<vmem>>, vector<1x8x256xf32>,
    return
  }
  func.func @transform_0(%arg0: i32, %arg1: i32) -> (i32, i32, i32) {
    %c0_i32 = arith.constant 0 : i32
    %c0_i32_0 = arith.constant 0 : i32
    return %arg0, %c0_i32, %arg1 : i32, i32, i32
  }
  func.func @transform_1(%arg0: i32, %arg1: i32) -> (i32, i32) {
    %c0_i32 = arith.constant 0 : i32
    %c0_i32_0 = arith.constant 0 : i32
    %c0_i32_1 = arith.constant 0 : i32
    return %c0_i32, %c0_i32_0 : i32, i32
  }
  func.func @transform_2(%arg0: i32, %arg1: i32) -> (i32, i32) {
    %c0_i32 = arith.constant 0 : i32
    %c0_i32_0 = arith.constant 0 : i32
    %c0_i32_1 = arith.constant 0 : i32
    return %c0_i32, %c0_i32_0 : i32, i32
  }
  func.func @transform_3(%arg0: i32, %arg1: i32) -> (i32, i32, i32) {
    %c0_i32 = arith.constant 0 : i32
    %c0_i32_0 = arith.constant 0 : i32
    return %arg0, %c0_i32, %arg1 : i32, i32, i32
  }
  func.func @transform_4(%arg0: i32, %arg1: i32) -> (i32, i32, i32) {
    %c0_i32 = arith.constant 0 : i32
    %c0_i32_0 = arith.constant 0 : i32
    return %arg0, %c0_i32, %arg1 : i32, i32, i32
  }
}

</mosaic_0001>

<bundles_post_ra>
// kernel: tpu_custom_call.1
= control target key start
LH: loop header
LB: loop body
LE: loop exit
PB: predicated region body
PF: predicated region fallthrough
CT: control target
= control target key end

     0   :  { %10 = vsyncpa [#allocation3], 0  ;;  %s993_s0 = inlined_call_operand.hbm [shape: f32[2,32,256], index: 0, kind: input, shape index: {}]   ;;  %s994_s1 = inlined_call_operand.vmem [shape: bf16[24,32], index: 1, kind: input, shape index: {}]   ;;  %s995_s2 = inlined_call_operand.vmem [shape: f32[24,1], index: 2, kind: input, shape index: {}]   ;;  %s996_s3 = inlined_call_operand.hbm [shape: f32[2,16,256], index: 3, kind: output, shape index: {0}]   ;;  %s997_s4 = inlined_call_operand.hbm [shape: f32[2,8,256], index: 4, kind: output, shape index: {1}]  }
   0x1   :  { %12 = vsyncpa [#allocation3 + $0x1], 0 }
   0x2   :  { %13 = vsyncpa [#allocation4], 0 }
   0x3   :  { %15 = vsyncpa [#allocation4 + $0x1], 0 }
   0x4   :  { %16 = vsyncpa [#allocation7], 0 }
   0x5   :  { %18 = vsyncpa [#allocation7 + $0x1], 0  ;;  %s794_s15 = smov 0   ;;  %s796_s16 = smov 0  }
   0x6   :  { %s798_s17 = smov 0   ;;  %s800_s18 = smov 0  }
   0x7   :  { %s802_s19 = smov 0   ;;  %s804_s20 = smov 0  }
   0x8 LB: > { %s515_s21 = sadd.s32 4294967295, %s759_s20   ;;  %s516_s22 = sadd.s32 4294967294, %s759_s20   ;;  %s759_s20 = sphi %s804_s20, %s24_s20   ;;  %s755_s19 = sphi %s802_s19, %s1008_s19   ;;  %s751_s18 = sphi %s800_s18, %s1007_s18   ;;  %s747_s17 = sphi %s798_s17, %s1006_s17   ;;  %s743_s16 = sphi %s796_s16, %s1005_s16   ;;  %s739_s15 = sphi %s794_s15, %s1004_s15  }
   0x9   : > { %s36_s23 = sadd.s32 1, %s755_s19  ;;  %s45_s24 = sadd.s32 1, %s747_s17 }
   0xa   : > { %p38_p0 = scmp.ge.s32.totalorder %s36_s23, 2  ;;  %p52_p1 = scmp.ne.s32.totalorder %s747_s17, %s743_s16 }
   0xb   : > { %p53_p2 = scmp.eq.s32.totalorder %s759_s20, 0  ;;  %p58_p3 = scmp.ne.s32.totalorder %s743_s16, %s739_s15 }
   0xc   : > { %s1010_s23 = smov (%p38_p0, %s36_s23), 0  ;;  %p59_p5 = scmp.eq.s32.totalorder %s515_s21, 0 }
   0xd   : > { %p835_p4 = por %p53_p2, %p52_p1  ;;  %s40_s26 = ssub.s32 %s755_s19, %s1010_s23 }
   0xe   : > { %p126_p6 = scmp.eq.s32.totalorder %s515_s21, 1  ;;  %p43_p7 = scmp.eq.s32.totalorder %s40_s26, 0 }
   0xf   : > { %p841_p8 = por %p59_p5, %p58_p3  ;;  %p132_p10 = scmp.eq.s32.totalorder %s516_s22, 1 }
  0x10   : > { %p845_p9 = por %p126_p6, %p52_p1  ;;  %p562_p13 = scmp.lt.s32.totalorder %s759_s20, 2 }
  0x11   : > { %s850_s29 = scalar_select %p43_p7, %s747_s17, %s45_s24  }
  0x12   : > { %p852_p11 = por %p132_p10, %p58_p3  ;;  %s186_s5 = sand.u32 1, %s747_s17  }
  0x13   : > { %s519_s6 = sshll.u32 %s186_s5, 6  ;;  %s538_s7 = sshll.u32 %s755_s19, 10 }
  0x14   : > { %s198_s10 = scalar_lea.hbm %s993_s0, %s538_s7  ;;  %s190_s11 = scalar_lea.vmem [#allocation2], %s519_s6 }
  0x15   : > { %s199_s12 = sshll.u32 %s190_s11, 4  ;;  %p865_p0 = pnand %p562_p13, %p835_p4  ;;  %s200_s12 = int_to_ptr.vmem [resolvable:$true] %s199_s12 }
  0x16   : > { %p522_p1 = scmp.ge.s32.totalorder %s759_s20, 1  ;;  %s187_s14 = scalar_lea.sflag [#allocation3], %s186_s5 }
  0x17   : > { %p623_p2 = pneg %p865_p0  ;;  %s634_s21 = scalar_lea.vmem %s200_s12, 1024 }
  0x18   : > { %p635_p3 = scmp.ne.s32.totalorder %s200_s12, %s634_s21  ;;  %s761_s22 = smov [#allocation2]  }
  0x19   : > { %s639_s24 = sshll.u32 %s761_s22, 4  ;;  %s640_s24 = int_to_ptr.vmem [resolvable:$false] %s639_s24 }
  0x1a   : > { %p637_p5 = pnand %p635_p3, %p623_p2  ;;  %s641_s26 = scalar_lea.vmem %s640_s24, 2048 }
  0x1b   : > { %p642_p7 = scmp.lt.s32.totalorder %s200_s12, %s640_s24  ;;  %p643_p10 = scmp.lt.s32.totalorder %s641_s26, %s634_s21 }
  0x1c   : > { %p638_p6 = pneg %p637_p5 }
  0x1d   : > { %p644_p12 = por %p643_p10, %p642_p7 }
  0x1f   : > { %p645_p4 = pnand %p644_p12, %p638_p6 }
  0x21   : > { %648 = shalt.err (!%p645_p4)
}
  0x22   : > { %s762_s25 = smov 256   ;;  %s763_s5 = smov 16  }
  0x23   : > { %554 = dma.hbm_to_vmem [thread:$0]  (!%p865_p0), %s198_s10, 1024, %s200_s12, %s187_s14, %s762_s25, %s762_s25, %s763_s5  }
  0x24   : > { %p207_p13 = scmp.lt.s32.totalorder %s759_s20, 3 }
  0x26   : > { %p208_p2 = pnand %p522_p1, %p207_p13 }
  0x27   : > { %s878_s6 = sand.u32 (!%p208_p2), 1, %s743_s16  }
  0x28   : > { %211 = sbr.rel (%p208_p2) target bundleno = 291 (0x123), region = 32  ;;  %s523_s7 = sshll.u32 (!%p208_p2), %s878_s6, 6 }
  0x29   : > { %s214_s8 = scalar_lea.sflag (!%p208_p2), [#allocation3], %s878_s6  ;;  %s217_s9 = scalar_lea.vmem (!%p208_p2), [#allocation2], %s523_s7 }
  0x2d   : > { %726 = dma.done.wait (%p841_p8), %s214_s8, 1024  }
  0x2e   : > { %728 = vsyncadd (%p841_p8), %s214_s8, 4294966272  ;;  %v764_v0 = vmov 0   ;;  %v256_v1 = vld [vmem:[%s217_s9 + $0x28] sm:$0xff]  ;;  %v258_v2 = vld [vmem:[%s217_s9 + $0x38] sm:$0xff]  ;;  %vm292_vm0 = vcmask 261120   ;;  %s525_s25 = sshll.u32 %s878_s6, 4 }
  0x2f   : > { %331 = vmatprep.mubr.bf16.mxu0 %v764_v0  ;;  %341 = vmatprep.mubr.bf16.mxu1 %v764_v0  ;;  %v255_v3 = vld [vmem:[%s217_s9 + $0x20] sm:$0xff]  ;;  %v262_v4 = vpack.c.bf16 %v258_v2, %v256_v1  ;;  %v257_v5 = vld [vmem:[%s217_s9 + $0x30] sm:$0xff]  ;;  %v252_v6 = vld [vmem:[%s217_s9 + $0x8] sm:$0xff]  ;;  %s524_s5 = sshll.u32 %s878_s6, 5  ;;  %s540_s7 = sshll.u32 %s751_s18, 8 }
  0x30   : > { %617 = vset.pattern.permute.xlu0 %v764_v0  ;;  %618 = vset.pattern.permute.xlu1 %v764_v0  ;;  %v254_v7 = vld [vmem:[%s217_s9 + $0x18] sm:$0xff]  ;;  %v261_v8 = vpack.c.bf16 %v257_v5, %v255_v3  ;;  %v251_v10 = vld [vmem:[%s217_s9] sm:$0xff]  ;;  %v253_v11 = vld [vmem:[%s217_s9 + $0x10] sm:$0xff]  ;;  %s246_s8 = scalar_lea.vmem [#allocation6], %s525_s25  ;;  %s904_s27 = scalar_lea.vmem [#allocation5], %s524_s5 }
  0x31   : > { %v260_v9 = vpack.c.bf16 %v254_v7, %v252_v6  ;;  %311 = vmatprep.subr.bf16.mxu0 %v262_v4  ;;  %541 = vmatprep.subr.bf16.mxu1 %v262_v4  ;;  %v259_v12 = vpack.c.bf16 %v253_v11, %v251_v10  ;;  %v266_v13 = vld [vmem:[%s995_s2] sm:$0xff]  ;;  %v268_v14 = vld [vmem:[%s995_s2 + $0x10] sm:$0xff]  ;;  %v620_v16 = vld [vmem:[%s994_s1 + $0x8] ss:$0 sps:$4 sm:$0xff]   ;;  %s396_s9 = sshll.u32 %s246_s8, 4  ;;  %s377_s10 = sshll.u32 %s904_s27, 4  ;;  %s914_s9 = int_to_ptr.vmem [resolvable:$true] %s396_s9  ;;  %s916_s10 = int_to_ptr.vmem [resolvable:$true] %s377_s10 }
  0x32   : > { %312 = vmatpush1.bf16.msra.mxu0 %v261_v8  ;;  %543 = vmatpush1.bf16.msra.mxu1 %v261_v8  ;;  %v619_v15 = vld [vmem:[%s994_s1] sm:$0xff]   ;;  %v267_v17 = vld [vmem:[%s995_s2 + $0x8] sm:$0xff]  ;;  %s539_s11 = sshll.u32 %s751_s18, 9  ;;  %s912_s14 = scalar_lea.hbm %s997_s4, %s540_s7 }
  0x33   : > { %313 = vmatprep.subr.bf16.mxu0 %v260_v9  ;;  %542 = vmatprep.subr.bf16.mxu1 %v260_v9  ;;  %s922_s22 = scalar_lea.hbm %s996_s3, %s539_s11  ;;  %s362_s24 = scalar_lea.sflag [#allocation7], %s878_s6 }
  0x34   : > { %271 = vperm.xlu0 %617, %v266_v13   ;;  %281 = vperm.xlu1 %618, %v268_v14   ;;  %s649_s26 = scalar_lea.vmem %s914_s9, 256  ;;  %s765_s25 = smov [#allocation6]  }
  0x35   : > { %p650_p8 = scmp.ne.s32.totalorder %s914_s9, %s649_s26  ;;  %s653_s5 = sshll.u32 %s765_s25, 4  ;;  %s654_s5 = int_to_ptr.vmem [resolvable:$false] %s653_s5 }
  0x36   : > { %314 = vmatpush1.bf16.msra.mxu0 %v259_v12  ;;  %544 = vmatpush1.bf16.msra.mxu1 %v259_v12  ;;  %s655_s7 = scalar_lea.vmem %s654_s5, 512  ;;  %p656_p1 = scmp.lt.s32.totalorder %s914_s9, %s654_s5 }
  0x37   : > { %p651_p12 = pnand %p650_p8, %p845_p9  ;;  %p657_p3 = scmp.lt.s32.totalorder %s655_s7, %s649_s26 }
  0x38   : > { %276 = vperm.xlu0 %617, %v267_v17  }
  0x39   : > { %528 = vmatmul.mubr.msk.bf16.vlgmr.msra.gmra.mxu0 %vm292_vm0, %v619_v15  ;;  %529 = vmatmul.mubr.msk.bf16.vlgmr.msra.gmra.mxu1 %vm292_vm0, %v620_v16  ;;  %p652_p0 = pneg %p651_p12  ;;  %p658_p5 = por %p657_p3, %p656_p1 }
  0x3b   : > { %p659_p6 = pnand %p658_p5, %p652_p0 }
  0xaf   : > { %v272_v18 = vpop.permute.xlu0 %271  ;;  %v282_v19 = vpop.permute.xlu1 %281 }
  0xb3   : > { %v277_v26 = vpop.permute.xlu0 %276 }
  0xf9   : > { %v333_v20 = vpop.f32.mrf.mxu0  ;;  %v343_v21 = vpop.f32.mrf.mxu1 }
  0xfa   : > { %v334_v22 = vadd.f32 %v333_v20, %v272_v18  ;;  %v344_v23 = vadd.f32 %v343_v21, %v282_v19 }
  0xfb   : > { %v335_v24 = vpop.f32.mrf.mxu0  ;;  %v345_v25 = vpop.f32.mrf.mxu1 }
  0xfc   : > { %350 = vst [vmem:[%s904_s27] sm:$0xff] %v334_v22  ;;  %v336_v27 = vadd.f32 %v335_v24, %v272_v18  ;;  %v346_v28 = vadd.f32 %v345_v25, %v282_v19  ;;  %354 = vst [vmem:[%s246_s8] sm:$0xff] %v344_v23 }
  0xfd   : > { %v337_v29 = vpop.f32.mrf.mxu0  ;;  %v347_v30 = vpop.f32.mrf.mxu1 }
  0xfe   : > { %351 = vst [vmem:[%s904_s27 + $0x8] sm:$0xff] %v336_v27  ;;  %355 = vst [vmem:[%s246_s8 + $0x8] sm:$0xff] %v346_v28  ;;  %v338_v31 = vadd.f32 %v337_v29, %v277_v26 }
  0xff   : > { %v339_v32 = vpop.f32.mrf.mxu0  ;;  %v348_v33 = vpop.f32.mrf.mxu1 }
 0x100   : > { %662 = shalt.err (!%p659_p6)
}
 0x101   : > { %s663_s8 = scalar_lea.hbm %s912_s14, 256  ;;  %s667_s13 = scalar_lea.hbm %s997_s4, 512 }
 0x102   : > { %p664_p7 = scmp.ne.s32.totalorder %s912_s14, %s663_s8  ;;  %p668_p13 = scmp.lt.s32.totalorder %s912_s14, %s997_s4 }
 0x103   : > { %p669_p2 = scmp.lt.s32.totalorder %s667_s13, %s663_s8 }
 0x104   : > { %p665_p10 = pnand %p664_p7, %p845_p9 }
 0x105   : > { %p670_p8 = por %p669_p2, %p668_p13 }
 0x106   : > { %p666_p4 = pneg %p665_p10 }
 0x108   : > { %p671_p12 = pnand %p670_p8, %p666_p4 }
 0x10a   : > { %674 = shalt.err (!%p671_p12)
}
 0x10b   : > { %548 = dma.vmem_to_hbm [thread:$0]  (%p845_p9), %s914_s9, 256, %s912_s14, %s362_s24   ;;  %352 = vst [vmem:[%s904_s27 + $0x10] sm:$0xff] %v338_v31  ;;  %v340_v34 = vadd.f32 %v339_v32, %v277_v26 }
 0x10c   : > { %s357_s26 = scalar_lea.sflag [#allocation4], %s878_s6  ;;  %s675_s25 = scalar_lea.vmem %s916_s10, 512 }
 0x10d   : > { %353 = vst [vmem:[%s904_s27 + $0x18] sm:$0xff] %v340_v34  ;;  %p676_p0 = scmp.ne.s32.totalorder %s916_s10, %s675_s25  ;;  %s766_s5 = smov [#allocation5]  }
 0x10e   : > { %s679_s7 = sshll.u32 %s766_s5, 4  ;;  %s680_s7 = int_to_ptr.vmem [resolvable:$false] %s679_s7 }
 0x10f   : > { %p677_p1 = pnand %p676_p0, %p845_p9  ;;  %s681_s8 = scalar_lea.vmem %s680_s7, 1024 }
 0x110   : > { %p682_p5 = scmp.lt.s32.totalorder %s916_s10, %s680_s7  ;;  %p683_p6 = scmp.lt.s32.totalorder %s681_s8, %s675_s25 }
 0x111   : > { %p678_p3 = pneg %p677_p1 }
 0x112   : > { %p684_p7 = por %p683_p6, %p682_p5 }
 0x114   : > { %p685_p10 = pnand %p684_p7, %p678_p3 }
 0x116   : > { %688 = shalt.err (!%p685_p10)
}
 0x117   : > { %s689_s9 = scalar_lea.hbm %s922_s22, 512  ;;  %s693_s24 = scalar_lea.hbm %s996_s3, 1024 }
 0x118   : > { %p690_p4 = scmp.ne.s32.totalorder %s922_s22, %s689_s9  ;;  %p694_p8 = scmp.lt.s32.totalorder %s922_s22, %s996_s3 }
 0x119   : > { %p695_p12 = scmp.lt.s32.totalorder %s693_s24, %s689_s9 }
 0x11a   : > { %p691_p13 = pnand %p690_p4, %p845_p9 }
 0x11b   : > { %p696_p0 = por %p695_p12, %p694_p8 }
 0x11c   : > { %p692_p2 = pneg %p691_p13 }
 0x11e   : > { %p697_p1 = pnand %p696_p0, %p692_p2 }
 0x120   : > { %700 = shalt.err (!%p697_p1)
}
 0x121   : > { %s767_s13 = smov 256   ;;  %s768_s18 = smov 16  }
 0x122   : > { %547 = dma.vmem_to_hbm [thread:$0]  (%p845_p9), %s916_s10, 512, %s922_s22, %s357_s26, %s767_s13, %s767_s13, %s768_s18  }
 0x123 PF: > { %s408_s21 = sand.u32 1, %s739_s15   ;;  %p1003_p3 = scmp.ge.s32.totalorder %s759_s20, 2 }
 0x124   : > { %s409_s25 = scalar_lea.sflag [#allocation4], %s408_s21 }
 0x125   : > { %p556_p5 = pnand %p1003_p3, %p852_p11 }
 0x127   : > { %p557_p6 = pneg %p556_p5 }
 0x129   : > { %730 = dma.done.wait (%p557_p6), %s409_s25, 512  }
 0x12a   : > { %732 = vsyncadd (%p557_p6), %s409_s25, 4294966784  ;;  %s418_s5 = scalar_lea.sflag [#allocation7], %s408_s21 }
 0x12b   : > { %734 = dma.done.wait (%p557_p6), %s418_s5, 256  }
 0x12c   : > { %736 = vsyncadd (%p557_p6), %s418_s5, 4294967040  ;;  %s24_s20 = sadd.s32 1, %s759_s20   ;;  %s1004_s15 = smov %s743_s16 }
 0x12d   : > { %p21_p7 = scmp.ge.s32.totalorder %s24_s20, 4   ;;  %s1005_s16 = smov %s747_s17 }
 0x12e   : > { %s1006_s17 = smov %s850_s29  ;;  %s1007_s18 = smov %s755_s19 }
 0x12f   : > { %s1008_s19 = smov %s1010_s23  ;;  %23 = sbr.rel (!%p21_p7) target bundleno = 8 (0x8), region = 94 }
 0x134   :  { %423 = vsyncpa [#allocation3], 1 }
 0x135   :  { %425 = vsyncpa [#allocation3 + $0x1], 1 }
 0x136   :  { %426 = vsyncpa [#allocation4], 1 }
 0x137   :  { %428 = vsyncpa [#allocation4 + $0x1], 1 }
 0x138   :  { %429 = vsyncpa [#allocation7], 1 }
 0x139   :  { %431 = vsyncpa [#allocation7 + $0x1], 1 }

</bundles_post_ra>
